<compile_context>
chip_gen: v7x
topology: tpu7x:2x2x1
jax: 0.10.0
libtpu: 0.0.40
codegen_flags: <defaults>
</compile_context>

<pallas_src>
import functools

import jax
import jax.numpy as jnp
from jax.experimental import pallas as pl
from jax.experimental.pallas import tpu as pltpu


def _qnetwork_kernel(x_ref,                 # (Bp, S)       f32
                     w1_ref, b1_ref,        # (S,  L1) bf16, (1, L1) f32
                     w2_ref, b2_ref,        # (L1, L2) bf16, (1, L2) f32
                     w3_ref, b3_ref,        # (L2, L3) bf16, (1, L3) f32
                     wh_ref, bh_ref,        # fused head: (L3, 1+A) bf16, (1, 1+A) f32
                     out_ref,               # (Bp, A)       f32
                     *, n_valid, n_actions):
    f32 = jnp.float32
    bf16 = jnp.bfloat16

    def dense(act_f32, w_ref, b_ref):
        # Cast the small activation to bf16 so the MXU runs its native bf16
        # path against the bf16 weights; f32 accumulation + f32 bias add.
        return jnp.dot(act_f32.astype(bf16), w_ref[...],
                       preferred_element_type=f32) + b_ref[...]

    h = jnp.maximum(dense(x_ref[...], w1_ref, b1_ref), 0.0)    # fp1 + ReLU
    h = jnp.maximum(dense(h, w2_ref, b2_ref), 0.0)              # fp2 + ReLU
    h = jnp.maximum(dense(h, w3_ref, b3_ref), 0.0)              # fp3 + ReLU

    # Fused dueling heads: one matmul producing [values | advantages].
    heads = dense(h, wh_ref, bh_ref)                             # (Bp, 1+A)
    values = heads[:, :1]                                        # (Bp, 1)
    advantages = heads[:, 1:]                                    # (Bp, A)

    # PyTorch advantages.mean() with no dim -> global scalar mean over all
    # elements of the *real* batch.  Mask out the padded rows; n_valid is a
    # static Python int baked in at trace time.
    row_ids = jax.lax.broadcasted_iota(jnp.int32, advantages.shape, 0)
    valid = row_ids < n_valid
    adv_sum = jnp.sum(jnp.where(valid, advantages, 0.0))
    adv_mean = adv_sum / float(n_valid * n_actions)

    out_ref[...] = values + (advantages - adv_mean)


def qnetwork_forward_steps(xs, params):
    """xs: (T, B, state_size) f32 -> (T, B, action_size) f32.

    Each timestep t is an independent forward pass of the module (its own
    global advantages-mean over that timestep's batch).  All weights are DMA'd
    to VMEM once and stay resident across the whole grid (constant index_map).
    """
    T, B, S = xs.shape
    L1 = params["b1"].shape[1]
    L2 = params["b2"].shape[1]
    L3 = params["b3"].shape[1]
    A = params["ba"].shape[1]
    HP = params["wh"].shape[1]          # 1 + A (fused head width)

    # Pad batch to a sublane-aligned multiple of 8; padded rows are masked out
    # of the mean inside the kernel and sliced off below.
    Bp = max(8, ((B + 7) // 8) * 8)
    if Bp != B:
        xs = jnp.pad(xs, ((0, 0), (0, Bp - B), (0, 0)))

    kernel = functools.partial(_qnetwork_kernel, n_valid=B, n_actions=A)

    def resident(shape):
        # Full-array block whose index never changes -> stays VMEM-resident
        # across the whole grid (weights fetched from HBM exactly once).
        return pl.BlockSpec(shape, lambda t: (0, 0))

    out = pl.pallas_call(
        kernel,
        grid=(T,),
        in_specs=[
            pl.BlockSpec((None, Bp, S), lambda t: (t, 0, 0)),    # per-step states
            resident((S, L1)),  resident((1, L1)),
            resident((L1, L2)), resident((1, L2)),
            resident((L2, L3)), resident((1, L3)),
            resident((L3, HP)), resident((1, HP)),
        ],
        out_specs=pl.BlockSpec((None, Bp, A), lambda t: (t, 0, 0)),
        out_shape=jax.ShapeDtypeStruct((T, Bp, A), jnp.float32),
        compiler_params=pltpu.CompilerParams(
            # Timesteps are independent -> v7x can split them across its 2 TCs.
            dimension_semantics=("parallel",),
            vmem_limit_bytes=16 << 20,
        ),
    )(xs,
      params["w1"], params["b1"],
      params["w2"], params["b2"],
      params["w3"], params["b3"],
      params["wh"], params["bh"])
    return out[:, :B, :]


def qnetwork_forward(x, params):
    """x: (B, state_size) f32 -> (B, action_size) f32.  Single forward pass."""
    return qnetwork_forward_steps(x[None], params)[0]


def make_params(key, state_size, action_size):
    """Deterministic PyTorch-Linear-style init: U(-1/sqrt(fan_in), 1/sqrt(fan_in)).

    Weights stored transposed relative to PyTorch ((in_features, out_features))
    and quantized to bf16 (halves HBM weight traffic; MXU-native operand dtype).
    Biases kept f32.  The fused dueling head (wh = [Wv | Wa], bh = [bv | ba])
    is precomputed here, once, rather than per forward call.
    """
    layers = [10 * 4 * state_size, 10 * 8 * state_size, 10 * 4 * state_size]
    dims = [(state_size, layers[0]),
            (layers[0], layers[1]),
            (layers[1], layers[2]),
            (layers[2], 1),
            (layers[2], action_size)]
    names = ["1", "2", "3", "v", "a"]
    params = {}
    for name, (fan_in, fan_out) in zip(names, dims):
        key, kw, kb = jax.random.split(key, 3)
        bound = 1.0 / (fan_in ** 0.5)
        w = jax.random.uniform(kw, (fan_in, fan_out), jnp.float32,
                               minval=-bound, maxval=bound)
        b = jax.random.uniform(kb, (1, fan_out), jnp.float32,
                               minval=-bound, maxval=bound)
        params["w" + name] = w.astype(jnp.bfloat16)
        params["b" + name] = b
    # Precomputed fused head: columns = [value | advantages].
    params["wh"] = jnp.concatenate([params["wv"], params["wa"]], axis=1)
    params["bh"] = jnp.concatenate([params["bv"], params["ba"]], axis=1)
    return params


def reference_forward(x, params):
    """Pure-JAX reference (unfused heads) with the same bf16-operand matmuls
    and f32 accumulation as the kernel."""
    f32, bf16 = jnp.float32, jnp.bfloat16

    def dense(a, w, b):
        return jnp.dot(a.astype(bf16), w, preferred_element_type=f32) + b

    h = jax.nn.relu(dense(x, params["w1"], params["b1"]))
    h = jax.nn.relu(dense(h, params["w2"], params["b2"]))
    h = jax.nn.relu(dense(h, params["w3"], params["b3"]))
    values = dense(h, params["wv"], params["bv"])
    advantages = dense(h, params["wa"], params["ba"])
    return values + (advantages - jnp.mean(advantages))


if __name__ == "__main__":
    state_size = 8      # hidden layers become 320, 640, 320
    action_size = 4
    batch = 2
    timesteps = 4

    key = jax.random.PRNGKey(0)
    key, kx = jax.random.split(key)
    params = make_params(key, state_size, action_size)

    # --- single forward pass (batch=2) ---
    x = jax.random.normal(kx, (batch, state_size), jnp.float32)
    out = jax.block_until_ready(qnetwork_forward(x, params))
    ref = reference_forward(x, params)
    assert out.shape == (batch, action_size)
    assert jnp.allclose(out, ref, atol=2e-3, rtol=2e-3), "single-step mismatch"

    # --- multi-timestep call: weights stay VMEM-resident across grid=(T,) ---
    key, kxs = jax.random.split(key)
    xs = jax.random.normal(kxs, (timesteps, batch, state_size), jnp.float32)
    outs = jax.block_until_ready(qnetwork_forward_steps(xs, params))
    refs = jnp.stack([reference_forward(xs[t], params) for t in range(timesteps)])
    assert outs.shape == (timesteps, batch, action_size)
    assert jnp.allclose(outs, refs, atol=2e-3, rtol=2e-3), "multi-step mismatch"

    print("KERNEL_OK")
</pallas_src>

<mosaic_0001>
module attributes {stable_mosaic.version = 11 : i64} {
  func.func @_qnetwork_kernel(%arg0: i32, %arg1: memref<1x8x8xf32, #tpu.memory_space<vmem>>, %arg2: memref<8x320xbf16, #tpu.memory_space<vmem>>, %arg3: memref<1x320xf32, #tpu.memory_space<vmem>>, %arg4: memref<320x640xbf16, #tpu.memory_space<vmem>>, %arg5: memref<1x640xf32, #tpu.memory_space<vmem>>, %arg6: memref<640x320xbf16, #tpu.memory_space<vmem>>, %arg7: memref<1x320xf32, #tpu.memory_space<vmem>>, %arg8: memref<320x5xbf16, #tpu.memory_space<vmem>>, %arg9: memref<1x5xf32, #tpu.memory_space<vmem>>, %arg10: memref<1x8x4xf32, #tpu.memory_space<vmem>>) attributes {dimension_semantics = [#tpu.dimension_semantics<parallel>], iteration_bounds = array<i64: 1>, scalar_prefetch = 0 : i64, scratch_operands = 0 : i64, tpu.core_type = #tpu.core_type<tc>, window_params = [{transform_indices = @transform_0, window_bounds = array<i64: 1, 8, 8>}, {pipeline_mode = #tpu.pipeline_mode<synchronous>, transform_indices = @transform_1, window_bounds = array<i64: 8, 320>}, {pipeline_mode = #tpu.pipeline_mode<synchronous>, transform_indices = @transform_2, window_bounds = array<i64: 1, 320>}, {pipeline_mode = #tpu.pipeline_mode<synchronous>, transform_indices = @transform_3, window_bounds = array<i64: 320, 640>}, {pipeline_mode = #tpu.pipeline_mode<synchronous>, transform_indices = @transform_4, window_bounds = array<i64: 1, 640>}, {pipeline_mode = #tpu.pipeline_mode<synchronous>, transform_indices = @transform_5, window_bounds = array<i64: 640, 320>}, {pipeline_mode = #tpu.pipeline_mode<synchronous>, transform_indices = @transform_6, window_bounds = array<i64: 1, 320>}, {pipeline_mode = #tpu.pipeline_mode<synchronous>, transform_indices = @transform_7, window_bounds = array<i64: 320, 5>}, {pipeline_mode = #tpu.pipeline_mode<synchronous>, transform_indices = @transform_8, window_bounds = array<i64: 1, 5>}, {transform_indices = @transform_9, window_bounds = array<i64: 1, 8, 4>}]} {
    %c0 = arith.constant 0 : index
    %c0_0 = arith.constant 0 : index
    %c0_1 = arith.constant 0 : index
    %0 = vector.load %arg1[%c0, %c0_0, %c0_1] : memref<1x8x8xf32, #tpu.memory_space<vmem>>, vector<1x8x8xf32>
    %1 = vector.shape_cast %0 : vector<1x8x8xf32> to vector<8x8xf32>
    %2 = arith.truncf %1 : vector<8x8xf32> to vector<8x8xbf16>
    %c0_2 = arith.constant 0 : index
    %c0_3 = arith.constant 0 : index
    %3 = vector.load %arg2[%c0_2, %c0_3] : memref<8x320xbf16, #tpu.memory_space<vmem>>, vector<8x320xbf16>
    %cst = arith.constant dense<0.000000e+00> : vector<8x320xf32>
    %4 = tpu.matmul %2, %3, %cst {dimension_numbers = #tpu.dot_dimension_numbers<[1], [0], [0], [1], [0, 0, 1, 1], [], []>} : vector<8x8xbf16>, vector<8x320xbf16>, vector<8x320xf32> -> vector<8x320xf32>
    %c0_4 = arith.constant 0 : index
    %c0_5 = arith.constant 0 : index
    %5 = vector.load %arg3[%c0_4, %c0_5] : memref<1x320xf32, #tpu.memory_space<vmem>>, vector<1x320xf32>
    %6 = vector.broadcast %5 : vector<1x320xf32> to vector<8x320xf32>
    %7 = arith.addf %4, %6 : vector<8x320xf32>
    %cst_6 = arith.constant 0.000000e+00 : f32
    %8 = vector.broadcast %cst_6 : f32 to vector<8x320xf32>
    %9 = arith.maximumf %7, %8 : vector<8x320xf32>
    %10 = arith.truncf %9 : vector<8x320xf32> to vector<8x320xbf16>
    %c0_7 = arith.constant 0 : index
    %c0_8 = arith.constant 0 : index
    %11 = vector.load %arg4[%c0_7, %c0_8] : memref<320x640xbf16, #tpu.memory_space<vmem>>, vector<320x640xbf16>
    %cst_9 = arith.constant dense<0.000000e+00> : vector<8x640xf32>
    %12 = tpu.matmul %10, %11, %cst_9 {dimension_numbers = #tpu.dot_dimension_numbers<[1], [0], [0], [1], [0, 0, 1, 1], [], []>} : vector<8x320xbf16>, vector<320x640xbf16>, vector<8x640xf32> -> vector<8x640xf32>
    %c0_10 = arith.constant 0 : index
    %c0_11 = arith.constant 0 : index
    %13 = vector.load %arg5[%c0_10, %c0_11] : memref<1x640xf32, #tpu.memory_space<vmem>>, vector<1x640xf32>
    %14 = vector.broadcast %13 : vector<1x640xf32> to vector<8x640xf32>
    %15 = arith.addf %12, %14 : vector<8x640xf32>
    %cst_12 = arith.constant 0.000000e+00 : f32
    %16 = vector.broadcast %cst_12 : f32 to vector<8x640xf32>
    %17 = arith.maximumf %15, %16 : vector<8x640xf32>
    %18 = arith.truncf %17 : vector<8x640xf32> to vector<8x640xbf16>
    %c0_13 = arith.constant 0 : index
    %c0_14 = arith.constant 0 : index
    %19 = vector.load %arg6[%c0_13, %c0_14] : memref<640x320xbf16, #tpu.memory_space<vmem>>, vector<640x320xbf16>
    %cst_15 = arith.constant dense<0.000000e+00> : vector<8x320xf32>
    %20 = tpu.matmul %18, %19, %cst_15 {dimension_numbers = #tpu.dot_dimension_numbers<[1], [0], [0], [1], [0, 0, 1, 1], [], []>} : vector<8x640xbf16>, vector<640x320xbf16>, vector<8x320xf32> -> vector<8x320xf32>
    %c0_16 = arith.constant 0 : index
    %c0_17 = arith.constant 0 : index
    %21 = vector.load %arg7[%c0_16, %c0_17] : memref<1x320xf32, #tpu.memory_space<vmem>>, vector<1x320xf32>
    %22 = vector.broadcast %21 : vector<1x320xf32> to vector<8x320xf32>
    %23 = arith.addf %20, %22 : vector<8x320xf32>
    %cst_18 = arith.constant 0.000000e+00 : f32
    %24 = vector.broadcast %cst_18 : f32 to vector<8x320xf32>
    %25 = arith.maximumf %23, %24 : vector<8x320xf32>
    %26 = arith.truncf %25 : vector<8x320xf32> to vector<8x320xbf16>
    %c0_19 = arith.constant 0 : index
    %c0_20 = arith.constant 0 : index
    %27 = vector.load %arg8[%c0_19, %c0_20] : memref<320x5xbf16, #tpu.memory_space<vmem>>, vector<320x5xbf16>
    %cst_21 = arith.constant dense<0.000000e+00> : vector<8x5xf32>
    %28 = tpu.matmul %26, %27, %cst_21 {dimension_numbers = #tpu.dot_dimension_numbers<[1], [0], [0], [1], [0, 0, 1, 1], [], []>} : vector<8x320xbf16>, vector<320x5xbf16>, vector<8x5xf32> -> vector<8x5xf32>
    %c0_22 = arith.constant 0 : index
    %c0_23 = arith.constant 0 : index
    %29 = vector.load %arg9[%c0_22, %c0_23] : memref<1x5xf32, #tpu.memory_space<vmem>>, vector<1x5xf32>
    %30 = vector.broadcast %29 : vector<1x5xf32> to vector<8x5xf32>
    %31 = arith.addf %28, %30 : vector<8x5xf32>
    %32 = vector.extract_strided_slice %31 {offsets = [0, 0], sizes = [8, 1], strides = [1, 1]} : vector<8x5xf32> to vector<8x1xf32>
    %33 = vector.extract_strided_slice %31 {offsets = [0, 1], sizes = [8, 4], strides = [1, 1]} : vector<8x5xf32> to vector<8x4xf32>
    %34 = tpu.iota {dimensions = array<i32: 0>} : vector<8x4xi32>
    %c2_i32 = arith.constant 2 : i32
    %35 = vector.broadcast %c2_i32 : i32 to vector<8x4xi32>
    %36 = arith.cmpi slt, %34, %35 : vector<8x4xi32>
    %cst_24 = arith.constant 0.000000e+00 : f32
    %37 = vector.broadcast %cst_24 : f32 to vector<8x4xf32>
    %38 = arith.select %36, %33, %37 : vector<8x4xi1>, vector<8x4xf32>
    %39 = vector.shape_cast %38 : vector<8x4xf32> to vector<1x8x4xf32>
    %cst_25 = arith.constant dense<0.000000e+00> : vector<1xf32>
    %40 = vector.multi_reduction <add>, %39, %cst_25 [1, 2] : vector<1x8x4xf32> to vector<1xf32>
    %41 = vector.shape_cast %40 : vector<1xf32> to vector<1x1x1xf32>
    %42 = vector.extract %41[0, 0, 0] : f32 from vector<1x1x1xf32>
    %cst_26 = arith.constant 8.000000e+00 : f32
    %43 = arith.divf %42, %cst_26 : f32
    %44 = vector.broadcast %43 : f32 to vector<8x4xf32>
    %45 = arith.subf %33, %44 : vector<8x4xf32>
    %46 = vector.broadcast %32 : vector<8x1xf32> to vector<8x4xf32>
    %47 = arith.addf %46, %45 : vector<8x4xf32>
    %c0_27 = arith.constant 0 : index
    %c0_28 = arith.constant 0 : index
    %c0_29 = arith.constant 0 : index
    %48 = vector.load %arg10[%c0_27, %c0_28, %c0_29] : memref<1x8x4xf32, #tpu.memory_space<vmem>>, vector<1x8x4xf32>
    %49 = vector.shape_cast %48 : vector<1x8x4xf32> to vector<8x4xf32>
    %50 = vector.shape_cast %47 : vector<8x4xf32> to vector<1x8x4xf32>
    tpu.vector_store %arg10[%c0_27, %c0_28, %c0_29], %50 {strides = array<i32>} : memref<1x8x4xf32, #tpu.memory_space<vmem>>, vector<1x8x4xf32>,
    return
  }
  func.func @transform_0(%arg0: i32) -> (i32, i32, i32) {
    %c0_i32 = arith.constant 0 : i32
    %c0_i32_0 = arith.constant 0 : i32
    %c0_i32_1 = arith.constant 0 : i32
    return %arg0, %c0_i32, %c0_i32_0 : i32, i32, i32
  }
  func.func @transform_1(%arg0: i32) -> (i32, i32) {
    %c0_i32 = arith.constant 0 : i32
    %c0_i32_0 = arith.constant 0 : i32
    %c0_i32_1 = arith.constant 0 : i32
    return %c0_i32, %c0_i32_0 : i32, i32
  }
  func.func @transform_2(%arg0: i32) -> (i32, i32) {
    %c0_i32 = arith.constant 0 : i32
    %c0_i32_0 = arith.constant 0 : i32
    %c0_i32_1 = arith.constant 0 : i32
    return %c0_i32, %c0_i32_0 : i32, i32
  }
  func.func @transform_3(%arg0: i32) -> (i32, i32) {
    %c0_i32 = arith.constant 0 : i32
    %c0_i32_0 = arith.constant 0 : i32
    %c0_i32_1 = arith.constant 0 : i32
    return %c0_i32, %c0_i32_0 : i32, i32
  }
  func.func @transform_4(%arg0: i32) -> (i32, i32) {
    %c0_i32 = arith.constant 0 : i32
    %c0_i32_0 = arith.constant 0 : i32
    %c0_i32_1 = arith.constant 0 : i32
    return %c0_i32, %c0_i32_0 : i32, i32
  }
  func.func @transform_5(%arg0: i32) -> (i32, i32) {
    %c0_i32 = arith.constant 0 : i32
    %c0_i32_0 = arith.constant 0 : i32
    %c0_i32_1 = arith.constant 0 : i32
    return %c0_i32, %c0_i32_0 : i32, i32
  }
  func.func @transform_6(%arg0: i32) -> (i32, i32) {
    %c0_i32 = arith.constant 0 : i32
    %c0_i32_0 = arith.constant 0 : i32
    %c0_i32_1 = arith.constant 0 : i32
    return %c0_i32, %c0_i32_0 : i32, i32
  }
  func.func @transform_7(%arg0: i32) -> (i32, i32) {
    %c0_i32 = arith.constant 0 : i32
    %c0_i32_0 = arith.constant 0 : i32
    %c0_i32_1 = arith.constant 0 : i32
    return %c0_i32, %c0_i32_0 : i32, i32
  }
  func.func @transform_8(%arg0: i32) -> (i32, i32) {
    %c0_i32 = arith.constant 0 : i32
    %c0_i32_0 = arith.constant 0 : i32
    %c0_i32_1 = arith.constant 0 : i32
    return %c0_i32, %c0_i32_0 : i32, i32
  }
  func.func @transform_9(%arg0: i32) -> (i32, i32, i32) {
    %c0_i32 = arith.constant 0 : i32
    %c0_i32_0 = arith.constant 0 : i32
    %c0_i32_1 = arith.constant 0 : i32
    return %arg0, %c0_i32, %c0_i32_0 : i32, i32, i32
  }
}

</mosaic_0001>

<bundles_post_ra>
// kernel: tpu_custom_call.1
= control target key start
LH: loop header
LB: loop body
LE: loop exit
PB: predicated region body
PF: predicated region fallthrough
CT: control target
= control target key end

     0   :  { %vm66_vm0 = vcmask 1043456   ;;  %v3206_v1 = vmov 0   ;;  %v3207_v3 = vmov 0.0   ;;  %vm3208_vm1 = vmmov 0   ;;  %s4085_s1 = inlined_call_operand.vmem [shape: bf16[8,320], index: 1, kind: input, shape index: {}]   ;;  %s4086_s0 = inlined_call_operand.vmem [shape: f32[1,8,8], index: 0, kind: input, shape index: {}]   ;;  %s4087_s3 = inlined_call_operand.vmem [shape: bf16[320,640], index: 3, kind: input, shape index: {}]   ;;  %s4088_s5 = inlined_call_operand.vmem [shape: bf16[640,320], index: 5, kind: input, shape index: {}]   ;;  %s4089_s2 = inlined_call_operand.vmem [shape: f32[1,320], index: 2, kind: input, shape index: {}]   ;;  %s4090_s4 = inlined_call_operand.vmem [shape: f32[1,640], index: 4, kind: input, shape index: {}]   ;;  %s4091_s7 = inlined_call_operand.vmem [shape: bf16[320,5], index: 7, kind: input, shape index: {}]   ;;  %s4092_s6 = inlined_call_operand.vmem [shape: f32[1,320], index: 6, kind: input, shape index: {}]   ;;  %s4093_s8 = inlined_call_operand.vmem [shape: f32[1,5], index: 8, kind: input, shape index: {}]   ;;  %s4094_s9 = inlined_call_operand.vmem [shape: f32[1,8,4], index: 9, kind: output, shape index: {}]  }
   0x1   :  { %v35_v0 = vld [vmem:[%s4085_s1] sm:$0xff]  ;;  %108 = vmatprep.mubr.bf16.mxu0 %v3206_v1  ;;  %2803 = vmatprep.subr.bf16.mxu1 %v3207_v3  ;;  %v2885_v6 = vld [vmem:[%s4085_s1 + $0x8] ss:$0 sps:$4 sm:$0xff]   ;;  %vm62_vm2 = vcmask 64512   ;;  %v2903_v19 = vld [vmem:[%s4087_s3 + $0x5c] ss:$20 sps:$4 sm:$0xff]  }
   0x2   :  { %v33_v2 = vld [vmem:[%s4086_s0] sm:$0xff]  ;;  %v2444_v4 = vcombine.high %v35_v0, %v35_v0  ;;  %v2443_v5 = vcombine.low %v35_v0, %v35_v0  ;;  %2805 = vmatprep.mubr.msk.bf16.mxu1 %vm3208_vm1, %v3207_v3  ;;  %2881 = vset.pattern.permute.xlu1 %v3206_v1  ;;  %v74_v10 = vsel %vm66_vm0, %v2885_v6, 0  ;;  %v2889_v12 = vld [vmem:[%s4087_s3 + $0x8] ss:$20 sps:$4 sm:$0xff]   ;;  %v2901_v21 = vld [vmem:[%s4087_s3 + $0x58] ss:$20 sps:$4 sm:$0xff]  }
   0x3   :  { %v2888_v7 = vld [vmem:[%s4087_s3 + $0x4] ss:$20 sps:$4 sm:$0xff]   ;;  %2882 = vset.pattern.permute.xlu0 %v3206_v1  ;;  %v34_v9 = vpack.c.bf16 %v33_v2, %v33_v2  ;;  %v2886_v11 = vld [vmem:[%s4087_s3] ss:$20 sps:$4 sm:$0xff]   ;;  %2804 = vmatpush3.bf16.msra.mxu1 %v74_v10  ;;  %v2892_v16 = vld [vmem:[%s4087_s3 + $0x28] ss:$20 sps:$4 sm:$0xff]  }
   0x4   :  { %2446 = vmatprep.subr.msk.bf16.mxu0 %vm66_vm0, %v2444_v4  ;;  %v68_v8 = vsel %vm66_vm0, %v2443_v5, 0  ;;  %v2891_v13 = vld [vmem:[%s4087_s3 + $0xc] ss:$20 sps:$4 sm:$0xff]   ;;  %v2897_v15 = vld [vmem:[%s4087_s3 + $0x34] ss:$20 sps:$4 sm:$0xff]   ;;  %vm830_vm3 = vcmask 523264  }
   0x5   :  { %77 = vmatpush1.bf16.msra.mxu0 %v68_v8  ;;  %v2894_v14 = vld [vmem:[%s4087_s3 + $0x2c] ss:$20 sps:$4 sm:$0xff]   ;;  %916 = vmatprep.subr.bf16.mxu1 %v2891_v13  ;;  %v2895_v17 = vld [vmem:[%s4087_s3 + $0x30] ss:$20 sps:$4 sm:$0xff]   ;;  %v2900_v18 = vld [vmem:[%s4087_s3 + $0x54] ss:$20 sps:$4 sm:$0xff]  }
   0x6   :  { %834 = vmatprep.subr.bf16.mxu0 %v2888_v7  ;;  %2806 = vmatmul.mubr.msk.bf16.vlgmr.msra.gmra.mrb[0].mxu1 %vm62_vm2, %v34_v9  ;;  %v2898_v20 = vld [vmem:[%s4087_s3 + $0x50] ss:$20 sps:$4 sm:$0xff]   ;;  %v2904_v24 = vld [vmem:[%s4087_s3 + $0x78] ss:$20 sps:$4 sm:$0xff]   ;;  %v2907_v25 = vld [vmem:[%s4087_s3 + $0x80] ss:$20 sps:$4 sm:$0xff]  }
   0x7   :  { %917 = vmatpush1.bf16.msra.mxu1 %v2889_v12  ;;  %v2906_v22 = vld [vmem:[%s4087_s3 + $0x7c] ss:$20 sps:$4 sm:$0xff]   ;;  %v2909_v23 = vld [vmem:[%s4087_s3 + $0x84] ss:$20 sps:$4 sm:$0xff]   ;;  %v2915_v27 = vld [vmem:[%s4087_s3 + $0xac] ss:$20 sps:$4 sm:$0xff]  }
   0x8   :  { %2447 = vmatmul.mubr.msk.bf16.vlgmr.msra.gmra.mrb[0].mxu0 %vm62_vm2, %v34_v9  ;;  %918 = vmatprep.subr.bf16.mxu1 %v2897_v15  ;;  %v2912_v26 = vld [vmem:[%s4087_s3 + $0xa4] ss:$20 sps:$4 sm:$0xff]   ;;  %v2910_v28 = vld [vmem:[%s4087_s3 + $0xa0] ss:$20 sps:$4 sm:$0xff]   ;;  %v2913_v29 = vld [vmem:[%s4087_s3 + $0xa8] ss:$20 sps:$4 sm:$0xff]  }
   0x9   :  { %835 = vmatpush1.bf16.msra.mxu0 %v2886_v11  ;;  %v2918_v30 = vld [vmem:[%s4087_s3 + $0xcc] ss:$20 sps:$4 sm:$0xff]   ;;  %v2921_v31 = vld [vmem:[%s4087_s3 + $0xd4] ss:$20 sps:$4 sm:$0xff]   ;;  %v2919_v33 = vld [vmem:[%s4087_s3 + $0xd0] ss:$20 sps:$4 sm:$0xff]  }
   0xa   :  { %836 = vmatprep.subr.bf16.mxu0 %v2894_v14  ;;  %v2916_v32 = vld [vmem:[%s4087_s3 + $0xc8] ss:$20 sps:$4 sm:$0xff]   ;;  %v2922_v36 = vld [vmem:[%s4087_s3 + $0xf0] ss:$20 sps:$4 sm:$0xff]   ;;  %v2925_v37 = vld [vmem:[%s4087_s3 + $0xf8] ss:$20 sps:$4 sm:$0xff]   ;;  %v39_v14 = vlaneseq }
   0xb   :  { %919 = vmatpush1.bf16.msra.mxu1 %v2895_v17  ;;  %v2924_v34 = vld [vmem:[%s4087_s3 + $0xf4] ss:$20 sps:$4 sm:$0xff]   ;;  %v2927_v35 = vld [vmem:[%s4087_s3 + $0xfc] ss:$20 sps:$4 sm:$0xff]   ;;  %v2933_v39 = vld [vmem:[%s4087_s3 + $0x124] ss:$20 sps:$4 sm:$0xff]  }
   0xc   :  { %920 = vmatprep.subr.bf16.mxu1 %v2903_v19  ;;  %v2930_v38 = vld [vmem:[%s4087_s3 + $0x11c] ss:$20 sps:$4 sm:$0xff]   ;;  %v2928_v40 = vld [vmem:[%s4087_s3 + $0x118] ss:$20 sps:$4 sm:$0xff]   ;;  %v2931_v41 = vld [vmem:[%s4087_s3 + $0x120] ss:$20 sps:$4 sm:$0xff]  }
   0xd   :  { %837 = vmatpush1.bf16.msra.mxu0 %v2892_v16  ;;  %v2936_v42 = vld [vmem:[%s4087_s3 + $0x144] ss:$20 sps:$4 sm:$0xff]   ;;  %v2939_v43 = vld [vmem:[%s4087_s3 + $0x14c] ss:$20 sps:$4 sm:$0xff]   ;;  %v2937_v45 = vld [vmem:[%s4087_s3 + $0x148] ss:$20 sps:$4 sm:$0xff]  }
   0xe   :  { %838 = vmatprep.subr.bf16.mxu0 %v2900_v18  ;;  %v2934_v44 = vld [vmem:[%s4087_s3 + $0x140] ss:$20 sps:$4 sm:$0xff]   ;;  %v2940_v48 = vld [vmem:[%s4087_s3 + $0x168] ss:$20 sps:$4 sm:$0xff]   ;;  %v2943_v49 = vld [vmem:[%s4087_s3 + $0x170] ss:$20 sps:$4 sm:$0xff]  }
   0xf   :  { %921 = vmatpush1.bf16.msra.mxu1 %v2901_v21  ;;  %v2942_v46 = vld [vmem:[%s4087_s3 + $0x16c] ss:$20 sps:$4 sm:$0xff]   ;;  %v2945_v47 = vld [vmem:[%s4087_s3 + $0x174] ss:$20 sps:$4 sm:$0xff]   ;;  %v2951_v51 = vld [vmem:[%s4087_s3 + $0x19c] ss:$20 sps:$4 sm:$0xff]  }
  0x10   :  { %922 = vmatprep.subr.bf16.mxu1 %v2909_v23  ;;  %v2948_v50 = vld [vmem:[%s4087_s3 + $0x194] ss:$20 sps:$4 sm:$0xff]   ;;  %v2946_v52 = vld [vmem:[%s4087_s3 + $0x190] ss:$20 sps:$4 sm:$0xff]   ;;  %v2949_v53 = vld [vmem:[%s4087_s3 + $0x198] ss:$20 sps:$4 sm:$0xff]  }
  0x11   :  { %839 = vmatpush1.bf16.msra.mxu0 %v2898_v20  ;;  %v2954_v54 = vld [vmem:[%s4087_s3 + $0x1bc] ss:$20 sps:$4 sm:$0xff]   ;;  %v2957_v55 = vld [vmem:[%s4087_s3 + $0x1c4] ss:$20 sps:$4 sm:$0xff]   ;;  %v2955_v57 = vld [vmem:[%s4087_s3 + $0x1c0] ss:$20 sps:$4 sm:$0xff]  }
  0x12   :  { %840 = vmatprep.subr.bf16.mxu0 %v2906_v22  ;;  %v2952_v56 = vld [vmem:[%s4087_s3 + $0x1b8] ss:$20 sps:$4 sm:$0xff]   ;;  %v2958_v60 = vld [vmem:[%s4087_s3 + $0x1e0] ss:$20 sps:$4 sm:$0xff]   ;;  %v2961_v61 = vld [vmem:[%s4087_s3 + $0x1e8] ss:$20 sps:$4 sm:$0xff]  }
  0x13   :  { %923 = vmatpush1.bf16.msra.mxu1 %v2907_v25  ;;  %v2960_v58 = vld [vmem:[%s4087_s3 + $0x1e4] ss:$20 sps:$4 sm:$0xff]   ;;  %v2963_v59 = vld [vmem:[%s4087_s3 + $0x1ec] ss:$20 sps:$4 sm:$0xff]   ;;  %v2969_v63 = vld [vmem:[%s4087_s3 + $0x214] ss:$20 sps:$4 sm:$0xff]  }
  0x14   :  { %924 = vmatprep.subr.bf16.mxu1 %v2915_v27  ;;  %v2966_v62 = vld [vmem:[%s4087_s3 + $0x20c] ss:$20 sps:$4 sm:$0xff]   ;;  %v2964_v0 = vld [vmem:[%s4087_s3 + $0x208] ss:$20 sps:$4 sm:$0xff]   ;;  %v2967_v2 = vld [vmem:[%s4087_s3 + $0x210] ss:$20 sps:$4 sm:$0xff]  }
  0x15   :  { %841 = vmatpush1.bf16.msra.mxu0 %v2904_v24  ;;  %v2972_v4 = vld [vmem:[%s4087_s3 + $0x234] ss:$20 sps:$4 sm:$0xff]   ;;  %v2975_v5 = vld [vmem:[%s4087_s3 + $0x23c] ss:$20 sps:$4 sm:$0xff]   ;;  %v2973_v7 = vld [vmem:[%s4087_s3 + $0x238] ss:$20 sps:$4 sm:$0xff]  }
  0x16   :  { %842 = vmatprep.subr.bf16.mxu0 %v2912_v26  ;;  %v2970_v6 = vld [vmem:[%s4087_s3 + $0x230] ss:$20 sps:$4 sm:$0xff]   ;;  %v2976_v10 = vld [vmem:[%s4087_s3 + $0x258] ss:$20 sps:$4 sm:$0xff]   ;;  %v2979_v11 = vld [vmem:[%s4087_s3 + $0x260] ss:$20 sps:$4 sm:$0xff]  }
  0x17   :  { %925 = vmatpush1.bf16.msra.mxu1 %v2913_v29  ;;  %v2978_v8 = vld [vmem:[%s4087_s3 + $0x25c] ss:$20 sps:$4 sm:$0xff]   ;;  %v2981_v9 = vld [vmem:[%s4087_s3 + $0x264] ss:$20 sps:$4 sm:$0xff]   ;;  %v2987_v13 = vld [vmem:[%s4087_s3 + $0x28c] ss:$20 sps:$4 sm:$0xff]  }
  0x18   :  { %926 = vmatprep.subr.bf16.mxu1 %v2921_v31  ;;  %v2984_v12 = vld [vmem:[%s4087_s3 + $0x284] ss:$20 sps:$4 sm:$0xff]   ;;  %v3476_v15 = vshrl.u32 %v39_v14, 7  ;;  %v37_v16 = vld [vmem:[%s4089_s2] sm:$0x7]  ;;  %vm2412_vm5 = vcmask 31744  }
  0x19   :  { %843 = vmatpush1.bf16.msra.mxu0 %v2910_v28  ;;  %v3023_v14 = vld [vmem:[%s4087_s3 + $0x100] ss:$20 sps:$4 sm:$0xff]  }
  0x1a   :  { %844 = vmatprep.subr.bf16.mxu0 %v2918_v30  ;;  %v3482_v17 = vsub.s32 0, %v3476_v15  ;;  %v3485_v18 = vsub.s32 1, %v3476_v15  ;;  %vm2406_vm4 = vcmp.lt.s32.totalorder %v3476_v15, 2 }
  0x1b   :  { %927 = vmatpush1.bf16.msra.mxu1 %v2919_v33  ;;  %v3490_v33 = vsub.s32 2, %v3476_v15 }
  0x1c   :  { %928 = vmatprep.subr.bf16.mxu1 %v2927_v35  ;;  %v42_v19 = vrot.slane %v37_v16, %v3482_v17  ;;  %v46_v20 = vrot.slane %v37_v16, %v3485_v18  ;;  %v2982_v35 = vld [vmem:[%s4087_s3 + $0x280] ss:$20 sps:$4 sm:$0xff]  }
  0x1d   :  { %845 = vmatpush1.bf16.msra.mxu0 %v2916_v32 }
  0x1e   :  { %846 = vmatprep.subr.bf16.mxu0 %v2924_v34 }
  0x1f   :  { %929 = vmatpush1.bf16.msra.mxu1 %v2925_v37 }
  0x20   :  { %930 = vmatprep.subr.bf16.mxu1 %v2933_v39  ;;  %v2993_v39 = vld [vmem:[%s4087_s3 + $0x2b4] ss:$20 sps:$4 sm:$0xff]  }
  0x21   :  { %847 = vmatpush1.bf16.msra.mxu0 %v2922_v36  ;;  %v2985_v36 = vld [vmem:[%s4087_s3 + $0x288] ss:$20 sps:$4 sm:$0xff]  }
  0x22   :  { %848 = vmatprep.subr.bf16.mxu0 %v2930_v38  ;;  %v2990_v38 = vld [vmem:[%s4087_s3 + $0x2ac] ss:$20 sps:$4 sm:$0xff]  }
  0x23   :  { %931 = vmatpush1.bf16.msra.mxu1 %v2931_v41  ;;  %v2988_v41 = vld [vmem:[%s4087_s3 + $0x2a8] ss:$20 sps:$4 sm:$0xff]  }
  0x24   :  { %932 = vmatprep.subr.bf16.mxu1 %v2939_v43  ;;  %v2996_v43 = vld [vmem:[%s4087_s3 + $0x2d4] ss:$20 sps:$4 sm:$0xff]  }
  0x25   :  { %849 = vmatpush1.bf16.msra.mxu0 %v2928_v40  ;;  %v50_v40 = vrot.slane %v37_v16, %v3490_v33  ;;  %v3024_v16 = vld [vmem:[%s4087_s3 + $0x268] ss:$20 sps:$4 sm:$0xff]  }
  0x26   :  { %850 = vmatprep.subr.bf16.mxu0 %v2936_v42  ;;  %v2991_v42 = vld [vmem:[%s4087_s3 + $0x2b0] ss:$20 sps:$4 sm:$0xff]  }
  0x27   :  { %933 = vmatpush1.bf16.msra.mxu1 %v2937_v45 }
  0x28   :  { %934 = vmatprep.subr.bf16.mxu1 %v2945_v47  ;;  %v2997_v47 = vld [vmem:[%s4087_s3 + $0x2d8] ss:$20 sps:$4 sm:$0xff]  }
  0x29   :  { %851 = vmatpush1.bf16.msra.mxu0 %v2934_v44  ;;  %v2999_v44 = vld [vmem:[%s4087_s3 + $0x2dc] ss:$20 sps:$4 sm:$0xff]  }
  0x2a   :  { %852 = vmatprep.subr.bf16.mxu0 %v2942_v46  ;;  %v2994_v46 = vld [vmem:[%s4087_s3 + $0x2d0] ss:$20 sps:$4 sm:$0xff]  }
  0x2b   :  { %935 = vmatpush1.bf16.msra.mxu1 %v2943_v49  ;;  %v3005_v49 = vld [vmem:[%s4087_s3 + $0x304] ss:$20 sps:$4 sm:$0xff]  }
  0x2c   :  { %936 = vmatprep.subr.bf16.mxu1 %v2951_v51  ;;  %v3000_v51 = vld [vmem:[%s4087_s3 + $0x2f8] ss:$20 sps:$4 sm:$0xff]  }
  0x2d   :  { %853 = vmatpush1.bf16.msra.mxu0 %v2940_v48  ;;  %v3002_v48 = vld [vmem:[%s4087_s3 + $0x2fc] ss:$20 sps:$4 sm:$0xff]  }
  0x2e   :  { %854 = vmatprep.subr.bf16.mxu0 %v2948_v50 }
  0x2f   :  { %937 = vmatpush1.bf16.msra.mxu1 %v2949_v53  ;;  %v3006_v53 = vld [vmem:[%s4087_s3 + $0x150] ss:$20 sps:$4 sm:$0xff]  }
  0x30   :  { %938 = vmatprep.subr.bf16.mxu1 %v2957_v55  ;;  %v3007_v55 = vld [vmem:[%s4087_s3 + $0x10] ss:$20 sps:$4 sm:$0xff]  }
  0x31   :  { %855 = vmatpush1.bf16.msra.mxu0 %v2946_v52  ;;  %v3003_v52 = vld [vmem:[%s4087_s3 + $0x300] ss:$20 sps:$4 sm:$0xff]  }
  0x32   :  { %856 = vmatprep.subr.bf16.mxu0 %v2954_v54 }
  0x33   :  { %939 = vmatpush1.bf16.msra.mxu1 %v2955_v57  ;;  %v3009_v57 = vld [vmem:[%s4087_s3 + $0x178] ss:$20 sps:$4 sm:$0xff]  }
  0x34   :  { %940 = vmatprep.subr.bf16.mxu1 %v2963_v59  ;;  %v3011_v59 = vld [vmem:[%s4087_s3 + $0x2b8] ss:$20 sps:$4 sm:$0xff]  }
  0x35   :  { %857 = vmatpush1.bf16.msra.mxu0 %v2952_v56  ;;  %v3008_v56 = vld [vmem:[%s4087_s3 + $0x290] ss:$20 sps:$4 sm:$0xff]  }
  0x36   :  { %858 = vmatprep.subr.bf16.mxu0 %v2960_v58  ;;  %v3010_v58 = vld [vmem:[%s4087_s3 + $0x38] ss:$20 sps:$4 sm:$0xff]  }
  0x37   :  { %941 = vmatpush1.bf16.msra.mxu1 %v2961_v61  ;;  %v3013_v61 = vld [vmem:[%s4087_s3 + $0x60] ss:$20 sps:$4 sm:$0xff]  }
  0x38   :  { %942 = vmatprep.subr.bf16.mxu1 %v2969_v63  ;;  %v3015_v63 = vld [vmem:[%s4087_s3 + $0x1c8] ss:$20 sps:$4 sm:$0xff]  }
  0x39   :  { %859 = vmatpush1.bf16.msra.mxu0 %v2958_v60  ;;  %v3012_v60 = vld [vmem:[%s4087_s3 + $0x1a0] ss:$20 sps:$4 sm:$0xff]  }
  0x3a   :  { %860 = vmatprep.subr.bf16.mxu0 %v2966_v62  ;;  %v3014_v62 = vld [vmem:[%s4087_s3 + $0x2e0] ss:$20 sps:$4 sm:$0xff]  }
  0x3b   :  { %943 = vmatpush1.bf16.msra.mxu1 %v2967_v2  ;;  %v3017_v2 = vld [vmem:[%s4087_s3 + $0x308] ss:$20 sps:$4 sm:$0xff]  }
  0x3c   :  { %944 = vmatprep.subr.bf16.mxu1 %v2975_v5  ;;  %v3028_v5 = vld [vmem:[%s4088_s5 + $0x4] ss:$12 sps:$4 sm:$0xff]  }
  0x3d   :  { %861 = vmatpush1.bf16.msra.mxu0 %v2964_v0  ;;  %v3016_v0 = vld [vmem:[%s4087_s3 + $0x88] ss:$20 sps:$4 sm:$0xff]  }
  0x3e   :  { %862 = vmatprep.subr.bf16.mxu0 %v2972_v4  ;;  %v3018_v4 = vld [vmem:[%s4087_s3 + $0x1f0] ss:$20 sps:$4 sm:$0xff]  }
  0x3f   :  { %945 = vmatpush1.bf16.msra.mxu1 %v2973_v7  ;;  %v3020_v7 = vld [vmem:[%s4087_s3 + $0x218] ss:$20 sps:$4 sm:$0xff]  }
  0x40   :  { %946 = vmatprep.subr.bf16.mxu1 %v2981_v9  ;;  %v3031_v9 = vld [vmem:[%s4088_s5 + $0x1c] ss:$12 sps:$4 sm:$0xff]  }
  0x41   :  { %863 = vmatpush1.bf16.msra.mxu0 %v2970_v6  ;;  %v3019_v6 = vld [vmem:[%s4087_s3 + $0xb0] ss:$20 sps:$4 sm:$0xff]  }
  0x42   :  { %864 = vmatprep.subr.bf16.mxu0 %v2978_v8  ;;  %v3026_v8 = vld [vmem:[%s4088_s5] ss:$12 sps:$4 sm:$0xff]  }
  0x43   :  { %947 = vmatpush1.bf16.msra.mxu1 %v2979_v11  ;;  %v3022_v11 = vld [vmem:[%s4087_s3 + $0x240] ss:$20 sps:$4 sm:$0xff]  }
  0x44   :  { %957 = vmatprep.subr.bf16.mxu1 %v2987_v13  ;;  %v3034_v13 = vld [vmem:[%s4088_s5 + $0x34] ss:$12 sps:$4 sm:$0xff]  }
  0x45   :  { %865 = vmatpush1.bf16.msra.mxu0 %v2976_v10  ;;  %v3021_v10 = vld [vmem:[%s4087_s3 + $0xd8] ss:$20 sps:$4 sm:$0xff]  }
  0x46   :  { %875 = vmatprep.subr.bf16.mxu0 %v2984_v12  ;;  %v3029_v12 = vld [vmem:[%s4088_s5 + $0x18] ss:$12 sps:$4 sm:$0xff]  }
  0xd9   :  { %v151_v22 = vpop.f32.mrb[0].mxu1 }
  0xda   :  { %v2807_v25 = vpop.f32.mrb[1].mxu1  ;;  %v152_v45 = vadd.f32 %v151_v22, %v50_v40  ;;  %v3035_v22 = vld [vmem:[%s4088_s5 + $0x48] ss:$12 sps:$4 sm:$0xff]  }
  0xdb   :  { %v110_v21 = vpop.f32.mrb[0].mxu0  ;;  %v154_v28 = vpop.f32.mrb[2].mxu1  ;;  %v3054_v25 = vld [vmem:[%s4088_s5 + $0x8] ss:$12 sps:$4 sm:$0xff]  }
  0xdc   :  { %v111_v23 = vadd.f32 %v110_v21, %v42_v19  ;;  %v112_v24 = vpop.f32.mrb[1].mxu0  ;;  %v2808_v31 = vpop.f32.mrb[3].mxu1  ;;  %v159_v50 = vmax.f32 %v152_v45, 0.0  ;;  %v3032_v19 = vld [vmem:[%s4088_s5 + $0x30] ss:$12 sps:$4 sm:$0xff]  }
  0xdd   :  { %v113_v26 = vadd.f32 %v112_v24, %v46_v20  ;;  %v114_v27 = vpop.f32.mrb[2].mxu0  ;;  %v3037_v20 = vld [vmem:[%s4088_s5 + $0x4c] ss:$12 sps:$4 sm:$0xff]   ;;  %v3025_v21 = vld [vmem:[%s4087_s3 + $0x128] ss:$20 sps:$4 sm:$0xff]  }
  0xde   :  { %v157_v29 = vmax.f32 %v111_v23, 0.0  ;;  %v115_v30 = vpop.f32.mrb[3].mxu0  ;;  %v162_v54 = vpack.c.bf16 %v159_v50, %v159_v50  ;;  %v3053_v23 = vld [vmem:[%s4088_s5 + $0xc8] ss:$12 sps:$4 sm:$0xff]   ;;  %v3040_v24 = vld [vmem:[%s4088_s5 + $0x64] ss:$12 sps:$4 sm:$0xff]  }
  0xdf   :  { %v158_v32 = vmax.f32 %v113_v26, 0.0  ;;  %v3038_v26 = vld [vmem:[%s4088_s5 + $0x60] ss:$12 sps:$4 sm:$0xff]   ;;  %v3043_v28 = vld [vmem:[%s4088_s5 + $0x7c] ss:$12 sps:$4 sm:$0xff]  }
  0xe0   :  { %v3498_v37 = vpack.c.bf16 %v157_v29, %v157_v29  ;;  %v3058_v27 = vld [vmem:[%s4088_s5 + $0xe0] ss:$12 sps:$4 sm:$0xff]   ;;  %v3041_v30 = vld [vmem:[%s4088_s5 + $0x78] ss:$12 sps:$4 sm:$0xff]   ;;  %v3073_v40 = vld [vmem:[%s4088_s5 + $0x128] ss:$12 sps:$4 sm:$0xff]  }
  0xe1   :  { %v161_v34 = vpack.c.bf16 %v158_v32, %v158_v32  ;;  %v3059_v29 = vld [vmem:[%s4088_s5 + $0x20] ss:$12 sps:$4 sm:$0xff]   ;;  %v3063_v31 = vld [vmem:[%s4088_s5 + $0xf8] ss:$12 sps:$4 sm:$0xff]   ;;  %v3057_v45 = vld [vmem:[%s4088_s5 + $0xdc] ss:$12 sps:$4 sm:$0xff]  }
  0xe2   :  { %v3046_v32 = vld [vmem:[%s4088_s5 + $0x94] ss:$12 sps:$4 sm:$0xff]   ;;  %v3067_v50 = vld [vmem:[%s4088_s5 + $0x10c] ss:$12 sps:$4 sm:$0xff]  }
  0xe3   :  { %866 = vmatprep.mubr.bf16.mxu0 %v161_v34  ;;  %948 = vmatprep.mubr.bf16.mxu1 %v161_v34 }
  0xe4   :  { %867 = vmatmul.mubr.bf16.vlgmr.msra.gmra.mrb[4].mxu0 %v3498_v37  ;;  %949 = vmatmul.mubr.bf16.vlgmr.msra.gmra.mrb[4].mxu1 %v3498_v37 }
  0xe5   :  { %876 = vmatpush1.bf16.msra.mxu0 %v2982_v35  ;;  %958 = vmatpush1.bf16.msra.mxu1 %v2985_v36  ;;  %v3044_v35 = vld [vmem:[%s4088_s5 + $0x90] ss:$12 sps:$4 sm:$0xff]  }
  0xe6   :  { %877 = vmatprep.subr.bf16.mxu0 %v2990_v38  ;;  %959 = vmatprep.subr.bf16.mxu1 %v2993_v39  ;;  %v3068_v36 = vld [vmem:[%s4088_s5 + $0x110] ss:$12 sps:$4 sm:$0xff]   ;;  %v3047_v39 = vld [vmem:[%s4088_s5 + $0xa8] ss:$12 sps:$4 sm:$0xff]  }
  0xe7   :  { %907 = vmatprep.mubr.bf16.mxu0 %v3206_v1  ;;  %989 = vmatprep.mubr.bf16.mxu1 %v3206_v1  ;;  %v3069_v38 = vld [vmem:[%s4088_s5 + $0x50] ss:$12 sps:$4 sm:$0xff]  }
  0xe9   :  { %878 = vmatpush1.bf16.msra.mxu0 %v2988_v41  ;;  %960 = vmatpush1.bf16.msra.mxu1 %v2991_v42  ;;  %v3052_v41 = vld [vmem:[%s4088_s5 + $0xc4] ss:$12 sps:$4 sm:$0xff]   ;;  %v3074_v42 = vld [vmem:[%s4088_s5 + $0x68] ss:$12 sps:$4 sm:$0xff]  }
  0xea   :  { %879 = vmatprep.subr.bf16.mxu0 %v2996_v43  ;;  %961 = vmatprep.subr.bf16.mxu1 %v2999_v44  ;;  %v3050_v43 = vld [vmem:[%s4088_s5 + $0xc0] ss:$12 sps:$4 sm:$0xff]  }
  0xeb   :  { %v3078_v44 = vld [vmem:[%s4088_s5 + $0x140] ss:$12 sps:$4 sm:$0xff]  }
  0xed   :  { %880 = vmatpush1.bf16.msra.mxu0 %v2994_v46  ;;  %962 = vmatpush1.bf16.msra.mxu1 %v2997_v47  ;;  %v3079_v46 = vld [vmem:[%s4088_s5 + $0x80] ss:$12 sps:$4 sm:$0xff]   ;;  %v3055_v47 = vld [vmem:[%s4088_s5 + $0xd8] ss:$12 sps:$4 sm:$0xff]  }
  0xee   :  { %881 = vmatprep.subr.bf16.mxu0 %v3002_v48  ;;  %963 = vmatprep.subr.bf16.mxu1 %v3005_v49  ;;  %v3062_v48 = vld [vmem:[%s4088_s5 + $0xf4] ss:$12 sps:$4 sm:$0xff]   ;;  %v3060_v49 = vld [vmem:[%s4088_s5 + $0xf0] ss:$12 sps:$4 sm:$0xff]  }
  0xf1   :  { %882 = vmatpush1.bf16.msra.mxu0 %v3000_v51  ;;  %964 = vmatpush1.bf16.msra.mxu1 %v3003_v52  ;;  %v3065_v51 = vld [vmem:[%s4088_s5 + $0x108] ss:$12 sps:$4 sm:$0xff]   ;;  %v3072_v52 = vld [vmem:[%s4088_s5 + $0x124] ss:$12 sps:$4 sm:$0xff]  }
  0xf2   :  { %2696 = vmatprep.subr.bf16.mxu0 %v3006_v53  ;;  %2809 = vmatprep.subr.bf16.mxu1 %v3207_v3  ;;  %v3070_v53 = vld [vmem:[%s4088_s5 + $0x120] ss:$12 sps:$4 sm:$0xff]  }
  0xf4   :  { %2549 = vmatmul.mubr.msk.bf16.vlgmr.msra.gmra.mrb[4].mxu0 %vm830_vm3, %v162_v54  ;;  %2550 = vmatmul.mubr.msk.bf16.vlgmr.msra.gmra.mrb[4].mxu1 %vm830_vm3, %v162_v54 }
  0xf5   :  { %2697 = vmatpush3.bf16.msra.mxu0 %v3007_v55  ;;  %1030 = vmatprep.mubr.bf16.mxu0 %v161_v34  ;;  %v3064_v34 = vld [vmem:[%s4088_s5 + $0x38] ss:$12 sps:$4 sm:$0xff]  }
  0xf6   :  { %2810 = vmatpush3.bf16.msra.mxu1 %v3008_v56  ;;  %2698 = vmatprep.subr.bf16.mxu0 %v3009_v57  ;;  %v3075_v55 = vld [vmem:[%s4088_s5 + $0x138] ss:$12 sps:$4 sm:$0xff]   ;;  %v3082_v56 = vld [vmem:[%s4088_s5 + $0x154] ss:$12 sps:$4 sm:$0xff]  }
  0xf7   :  { %2811 = vmatprep.subr.bf16.mxu1 %v3207_v3  ;;  %2817 = vmatprep.mubr.msk.bf16.mxu1 %vm3208_vm1, %v3207_v3  ;;  %v3083_v57 = vld [vmem:[%s4088_s5 + $0x158] ss:$12 sps:$4 sm:$0xff]  }
  0xf9   :  { %2699 = vmatpush3.bf16.msra.mxu0 %v3010_v58  ;;  %v3080_v58 = vld [vmem:[%s4088_s5 + $0x150] ss:$12 sps:$4 sm:$0xff]  }
  0xfa   :  { %2812 = vmatpush3.bf16.msra.mxu1 %v3011_v59  ;;  %2700 = vmatprep.subr.bf16.mxu0 %v3012_v60  ;;  %v3084_v59 = vld [vmem:[%s4088_s5 + $0x98] ss:$12 sps:$4 sm:$0xff]  }
  0xfb   :  { %2813 = vmatprep.subr.bf16.mxu1 %v3207_v3  ;;  %v3087_v60 = vld [vmem:[%s4088_s5 + $0x16c] ss:$12 sps:$4 sm:$0xff]  }
  0xfd   :  { %2701 = vmatpush3.bf16.msra.mxu0 %v3013_v61  ;;  %v3088_v61 = vld [vmem:[%s4088_s5 + $0x170] ss:$12 sps:$4 sm:$0xff]  }
  0xfe   :  { %2814 = vmatpush3.bf16.msra.mxu1 %v3014_v62  ;;  %2702 = vmatprep.subr.bf16.mxu0 %v3015_v63  ;;  %v3085_v62 = vld [vmem:[%s4088_s5 + $0x168] ss:$12 sps:$4 sm:$0xff]   ;;  %v3089_v63 = vld [vmem:[%s4088_s5 + $0xb0] ss:$12 sps:$4 sm:$0xff]  }
  0xff   :  { %2815 = vmatprep.subr.bf16.mxu1 %v3207_v3 }
 0x101   :  { %2703 = vmatpush3.bf16.msra.mxu0 %v3016_v0  ;;  %v3092_v0 = vld [vmem:[%s4088_s5 + $0x184] ss:$12 sps:$4 sm:$0xff]  }
 0x102   :  { %2816 = vmatpush3.bf16.msra.mxu1 %v3017_v2  ;;  %2704 = vmatprep.subr.bf16.mxu0 %v3018_v4  ;;  %v3093_v2 = vld [vmem:[%s4088_s5 + $0x248] ss:$12 sps:$4 sm:$0xff]   ;;  %v3764_v4 = vld [vmem:[%s4090_s4] sm:$0x1f] }
 0x103   :  { %1905 = vmatprep.subr.bf16.mxu1 %v3028_v5  ;;  %v299_v5 = vsub.s32 3, %v3476_v15 }
 0x105   :  { %2818 = vmatmul.mubr.msk.bf16.vlgmr.msra.gmra.mrb[8].mxu1 %vm830_vm3, %v162_v54  ;;  %2705 = vmatpush3.bf16.msra.mxu0 %v3019_v6  ;;  %v3077_v54 = vld [vmem:[%s4088_s5 + $0x13c] ss:$12 sps:$4 sm:$0xff]   ;;  %v288_v6 = vrot.slane %v3764_v4, %v3482_v17 }
 0x106   :  { %2706 = vmatprep.subr.bf16.mxu0 %v3020_v7  ;;  %1906 = vmatpush1.bf16.msra.mxu1 %v3026_v8  ;;  %v292_v7 = vrot.slane %v3764_v4, %v3485_v18  ;;  %v300_v8 = vrot.slane %v3764_v4, %v299_v5 }
 0x107   :  { %1907 = vmatprep.subr.bf16.mxu1 %v3031_v9 }
 0x109   :  { %2707 = vmatpush3.bf16.msra.mxu0 %v3021_v10 }
 0x10a   :  { %2708 = vmatprep.subr.bf16.mxu0 %v3022_v11  ;;  %1908 = vmatpush1.bf16.msra.mxu1 %v3029_v12 }
 0x10b   :  { %1909 = vmatprep.subr.bf16.mxu1 %v3034_v13 }
 0x10d   :  { %2709 = vmatpush3.bf16.msra.mxu0 %v3023_v14 }
 0x10e   :  { %2710 = vmatprep.subr.bf16.mxu0 %v3024_v16  ;;  %1910 = vmatpush1.bf16.msra.mxu1 %v3032_v19 }
 0x10f   :  { %1911 = vmatprep.subr.bf16.mxu1 %v3037_v20 }
 0x111   :  { %2711 = vmatpush3.bf16.msra.mxu0 %v3025_v21 }
 0x112   :  { %1912 = vmatpush1.bf16.msra.mxu1 %v3035_v22  ;;  %2723 = vmatprep.subr.bf16.mxu0 %v3053_v23 }
 0x113   :  { %1913 = vmatprep.subr.bf16.mxu1 %v3040_v24 }
 0x114   :  { %1031 = vmatmul.mubr.bf16.vlgmr.msra.gmra.mrb[8].mxu0 %v3498_v37  ;;  %v3049_v37 = vld [vmem:[%s4088_s5 + $0xac] ss:$12 sps:$4 sm:$0xff]  }
 0x115   :  { %2724 = vmatpush3.bf16.msra.mxu0 %v3054_v25 }
 0x116   :  { %1914 = vmatpush1.bf16.msra.mxu1 %v3038_v26  ;;  %2725 = vmatprep.subr.bf16.mxu0 %v3058_v27  ;;  %v3090_v27 = vld [vmem:[%s4088_s5 + $0x180] ss:$12 sps:$4 sm:$0xff]  }
 0x117   :  { %1915 = vmatprep.subr.bf16.mxu1 %v3043_v28  ;;  %v3094_v28 = vld [vmem:[%s4088_s5 + $0x188] ss:$12 sps:$4 sm:$0xff]  }
 0x119   :  { %2726 = vmatpush3.bf16.msra.mxu0 %v3059_v29 }
 0x11a   :  { %1916 = vmatpush1.bf16.msra.mxu1 %v3041_v30  ;;  %2727 = vmatprep.subr.bf16.mxu0 %v3063_v31  ;;  %v3097_v30 = vld [vmem:[%s4088_s5 + $0x19c] ss:$12 sps:$4 sm:$0xff]   ;;  %v3098_v31 = vld [vmem:[%s4088_s5 + $0x260] ss:$12 sps:$4 sm:$0xff]  }
 0x11b   :  { %1917 = vmatprep.subr.bf16.mxu1 %v3046_v32 }
 0x11d   :  { %2728 = vmatpush3.bf16.msra.mxu0 %v3064_v34  ;;  %v3095_v34 = vld [vmem:[%s4088_s5 + $0x198] ss:$12 sps:$4 sm:$0xff]  }
 0x11e   :  { %1918 = vmatpush1.bf16.msra.mxu1 %v3044_v35  ;;  %2729 = vmatprep.subr.bf16.mxu0 %v3068_v36  ;;  %v3099_v35 = vld [vmem:[%s4088_s5 + $0x1a0] ss:$12 sps:$4 sm:$0xff]  }
 0x11f   :  { %1919 = vmatprep.subr.bf16.mxu1 %v3049_v37  ;;  %v3102_v36 = vld [vmem:[%s4088_s5 + $0x1b4] ss:$12 sps:$4 sm:$0xff]   ;;  %v3103_v37 = vld [vmem:[%s4088_s5 + $0x278] ss:$12 sps:$4 sm:$0xff]  }
 0x121   :  { %2730 = vmatpush3.bf16.msra.mxu0 %v3069_v38  ;;  %v3100_v38 = vld [vmem:[%s4088_s5 + $0x1b0] ss:$12 sps:$4 sm:$0xff]  }
 0x122   :  { %1920 = vmatpush1.bf16.msra.mxu1 %v3047_v39  ;;  %2731 = vmatprep.subr.bf16.mxu0 %v3073_v40  ;;  %v3104_v39 = vld [vmem:[%s4088_s5 + $0x1b8] ss:$12 sps:$4 sm:$0xff]  }
 0x123   :  { %1921 = vmatprep.subr.bf16.mxu1 %v3052_v41  ;;  %v3107_v40 = vld [vmem:[%s4088_s5 + $0x1cc] ss:$12 sps:$4 sm:$0xff]   ;;  %v3108_v41 = vld [vmem:[%s4088_s5 + $0x290] ss:$12 sps:$4 sm:$0xff]  }
 0x125   :  { %2732 = vmatpush3.bf16.msra.mxu0 %v3074_v42 }
 0x126   :  { %1922 = vmatpush1.bf16.msra.mxu1 %v3050_v43  ;;  %2733 = vmatprep.subr.bf16.mxu0 %v3078_v44  ;;  %v3105_v44 = vld [vmem:[%s4088_s5 + $0x1c8] ss:$12 sps:$4 sm:$0xff]  }
 0x127   :  { %1923 = vmatprep.subr.bf16.mxu1 %v3057_v45  ;;  %v3109_v45 = vld [vmem:[%s4088_s5 + $0x1d0] ss:$12 sps:$4 sm:$0xff]  }
 0x129   :  { %2734 = vmatpush3.bf16.msra.mxu0 %v3079_v46 }
 0x12a   :  { %1924 = vmatpush1.bf16.msra.mxu1 %v3055_v47  ;;  %2735 = vmatprep.subr.bf16.mxu0 %v3083_v57  ;;  %v3112_v47 = vld [vmem:[%s4088_s5 + $0x1e4] ss:$12 sps:$4 sm:$0xff]   ;;  %v3122_v57 = vld [vmem:[%s4088_s5 + $0x214] ss:$12 sps:$4 sm:$0xff]  }
 0x12b   :  { %1925 = vmatprep.subr.bf16.mxu1 %v3062_v48  ;;  %v3113_v48 = vld [vmem:[%s4088_s5 + $0x2a8] ss:$12 sps:$4 sm:$0xff]  }
 0x12d   :  { %2736 = vmatpush3.bf16.msra.mxu0 %v3084_v59  ;;  %v303_v59 = vsub.s32 4, %v3476_v15 }
 0x12e   :  { %1926 = vmatpush1.bf16.msra.mxu1 %v3060_v49  ;;  %2737 = vmatprep.subr.bf16.mxu0 %v3088_v61  ;;  %v3124_v61 = vld [vmem:[%s4088_s5 + $0x218] ss:$12 sps:$4 sm:$0xff]  }
 0x12f   :  { %1927 = vmatprep.subr.bf16.mxu1 %v3067_v50  ;;  %v3110_v50 = vld [vmem:[%s4088_s5 + $0x1e0] ss:$12 sps:$4 sm:$0xff]   ;;  %v304_v5 = vrot.slane %v3764_v4, %v303_v59  ;;  %v3183_v59 = vld [vmem:[%s4088_s5 + $0x3a8] ss:$12 sps:$4 sm:$0xff]  }
 0x131   :  { %2738 = vmatpush3.bf16.msra.mxu0 %v3089_v63  ;;  %v3127_v63 = vld [vmem:[%s4088_s5 + $0x22c] ss:$12 sps:$4 sm:$0xff]  }
 0x132   :  { %1928 = vmatpush1.bf16.msra.mxu1 %v3065_v51  ;;  %2745 = vmatprep.subr.bf16.mxu0 %v3093_v2  ;;  %v3114_v51 = vld [vmem:[%s4088_s5 + $0x1e8] ss:$12 sps:$4 sm:$0xff]  }
 0x133   :  { %1929 = vmatprep.subr.bf16.mxu1 %v3072_v52  ;;  %v3117_v52 = vld [vmem:[%s4088_s5 + $0x1fc] ss:$12 sps:$4 sm:$0xff]  }
 0x136   :  { %1930 = vmatpush1.bf16.msra.mxu1 %v3070_v53  ;;  %v3118_v53 = vld [vmem:[%s4088_s5 + $0x2c0] ss:$12 sps:$4 sm:$0xff]  }
 0x137   :  { %1931 = vmatprep.subr.bf16.mxu1 %v3077_v54  ;;  %v3115_v54 = vld [vmem:[%s4088_s5 + $0x1f8] ss:$12 sps:$4 sm:$0xff]  }
 0x13a   :  { %1932 = vmatpush1.bf16.msra.mxu1 %v3075_v55  ;;  %v3119_v55 = vld [vmem:[%s4088_s5 + $0x200] ss:$12 sps:$4 sm:$0xff]  }
 0x13b   :  { %1933 = vmatprep.subr.bf16.mxu1 %v3082_v56  ;;  %v296_v56 = vrot.slane %v3764_v4, %v3490_v33  ;;  %v3132_v4 = vld [vmem:[%s4088_s5 + $0x244] ss:$12 sps:$4 sm:$0xff]  }
 0x13e   :  { %1934 = vmatpush1.bf16.msra.mxu1 %v3080_v58  ;;  %v3123_v58 = vld [vmem:[%s4088_s5 + $0x2d8] ss:$12 sps:$4 sm:$0xff]  }
 0x13f   :  { %1935 = vmatprep.subr.bf16.mxu1 %v3087_v60  ;;  %v3120_v60 = vld [vmem:[%s4088_s5 + $0x210] ss:$12 sps:$4 sm:$0xff]  }
 0x142   :  { %1936 = vmatpush1.bf16.msra.mxu1 %v3085_v62 }
 0x143   :  { %1946 = vmatprep.subr.bf16.mxu1 %v3092_v0  ;;  %v3128_v0 = vld [vmem:[%s4088_s5 + $0x2f0] ss:$12 sps:$4 sm:$0xff]  }
 0x1c7   :  { %v909_v9 = vpop.f32.mrb[4].mxu0  ;;  %v3772_v10 = vpop.f32.mrb[4].mxu1 }
 0x1c8   :  { %v2853_v11 = vadd.f32 %v909_v9, %v288_v6  ;;  %v911_v12 = vpop.f32.mrb[5].mxu0  ;;  %v993_v13 = vpop.f32.mrb[5].mxu1  ;;  %v2855_v62 = vadd.f32 %v3772_v10, %v296_v56  ;;  %v3125_v9 = vld [vmem:[%s4088_s5 + $0x228] ss:$12 sps:$4 sm:$0xff]   ;;  %v3129_v10 = vld [vmem:[%s4088_s5 + $0x230] ss:$12 sps:$4 sm:$0xff]  }
 0x1c9   :  { %v2854_v14 = vadd.f32 %v911_v12, %v292_v7  ;;  %v2856_v16 = vadd.f32 %v993_v13, %v300_v8  ;;  %v913_v19 = vpop.f32.mrb[6].mxu0  ;;  %v995_v20 = vpop.f32.mrb[6].mxu1  ;;  %v3182_v56 = vld [vmem:[%s4088_s5 + $0x394] ss:$12 sps:$4 sm:$0xff]  }
 0x1ca   :  { %v1078_v21 = vmax.f32 %v2853_v11, 0.0  ;;  %v914_v22 = vpop.f32.mrb[7].mxu0  ;;  %v996_v23 = vpop.f32.mrb[7].mxu1  ;;  %v1080_v11 = vmax.f32 %v2855_v62, 0.0  ;;  %v3133_v19 = vld [vmem:[%s4088_s5 + $0x308] ss:$12 sps:$4 sm:$0xff]  }
 0x1cb   :  { %v1079_v24 = vmax.f32 %v2854_v14, 0.0  ;;  %v1081_v25 = vmax.f32 %v2856_v16, 0.0  ;;  %v3130_v16 = vld [vmem:[%s4088_s5 + $0x240] ss:$12 sps:$4 sm:$0xff]   ;;  %v3134_v22 = vld [vmem:[%s4088_s5 + $0x258] ss:$12 sps:$4 sm:$0xff]  }
 0x1cc   :  { %v1083_v29 = vpack.c.bf16 %v1078_v21, %v1078_v21  ;;  %v1085_v20 = vpack.c.bf16 %v1080_v11, %v1080_v11  ;;  %v3136_v21 = vld [vmem:[%s4088_s5 + $0x25c] ss:$12 sps:$4 sm:$0xff]   ;;  %v3137_v23 = vld [vmem:[%s4088_s5 + $0x320] ss:$12 sps:$4 sm:$0xff]   ;;  %v3198_v11 = vld [vmem:[%s4091_s7 + $0x70] sm:$0xff]  }
 0x1cd   :  { %v1084_v26 = vpack.c.bf16 %v1079_v24, %v1079_v24  ;;  %v1086_v32 = vpack.c.bf16 %v1081_v25, %v1081_v25  ;;  %v3140_v24 = vld [vmem:[%s4088_s5 + $0x274] ss:$12 sps:$4 sm:$0xff]   ;;  %v3138_v25 = vld [vmem:[%s4088_s5 + $0x270] ss:$12 sps:$4 sm:$0xff]   ;;  %v3188_v62 = vld [vmem:[%s4091_s7 + $0x48] sm:$0xff]  }
 0x1cf   :  { %1937 = vmatprep.mubr.bf16.mxu1 %v1084_v26  ;;  %2060 = vmatprep.mubr.bf16.mxu0 %v1084_v26  ;;  %v3141_v26 = vld [vmem:[%s4088_s5 + $0x338] ss:$12 sps:$4 sm:$0xff]  }
 0x1d0   :  { %1938 = vmatmul.mubr.bf16.vlgmr.msra.gmra.mrb[12].mxu1 %v1083_v29  ;;  %2061 = vmatmul.mubr.bf16.vlgmr.msra.gmra.mrb[12].mxu0 %v1083_v29  ;;  %v3145_v29 = vld [vmem:[%s4088_s5 + $0x350] ss:$12 sps:$4 sm:$0xff]  }
 0x1d1   :  { %1947 = vmatpush1.bf16.msra.mxu1 %v3090_v27  ;;  %2746 = vmatpush3.bf16.msra.mxu0 %v3094_v28  ;;  %v3144_v27 = vld [vmem:[%s4088_s5 + $0x28c] ss:$12 sps:$4 sm:$0xff]   ;;  %v3142_v28 = vld [vmem:[%s4088_s5 + $0x288] ss:$12 sps:$4 sm:$0xff]  }
 0x1d2   :  { %1978 = vmatprep.mubr.bf16.mxu1 %v1086_v32  ;;  %2100 = vmatprep.mubr.bf16.mxu0 %v1086_v32  ;;  %v3149_v32 = vld [vmem:[%s4088_s5 + $0x368] ss:$12 sps:$4 sm:$0xff]  }
 0x1d3   :  { %1948 = vmatprep.subr.bf16.mxu1 %v3097_v30  ;;  %2747 = vmatprep.subr.bf16.mxu0 %v3098_v31  ;;  %v3148_v30 = vld [vmem:[%s4088_s5 + $0x2a4] ss:$12 sps:$4 sm:$0xff]   ;;  %v3146_v31 = vld [vmem:[%s4088_s5 + $0x2a0] ss:$12 sps:$4 sm:$0xff]  }
 0x1d5   :  { %1949 = vmatpush1.bf16.msra.mxu1 %v3095_v34  ;;  %2748 = vmatpush3.bf16.msra.mxu0 %v3099_v35  ;;  %v3152_v34 = vld [vmem:[%s4088_s5 + $0x2bc] ss:$12 sps:$4 sm:$0xff]   ;;  %v3150_v35 = vld [vmem:[%s4088_s5 + $0x2b8] ss:$12 sps:$4 sm:$0xff]  }
 0x1d6   :  { %1950 = vmatprep.subr.bf16.mxu1 %v3102_v36  ;;  %2749 = vmatprep.subr.bf16.mxu0 %v3103_v37  ;;  %v3153_v36 = vld [vmem:[%s4088_s5 + $0x380] ss:$12 sps:$4 sm:$0xff]  }
 0x1d7   :  { %v3156_v37 = vld [vmem:[%s4088_s5 + $0x2d4] ss:$12 sps:$4 sm:$0xff]  }
 0x1d8   :  { %v1072_v42 = vpop.f32.mrb[8].mxu1 }
 0x1d9   :  { %v2819_v43 = vpop.f32.mrb[9].mxu1  ;;  %1951 = vmatpush1.bf16.msra.mxu1 %v3100_v38  ;;  %2750 = vmatpush3.bf16.msra.mxu0 %v3104_v39  ;;  %v3154_v38 = vld [vmem:[%s4088_s5 + $0x2d0] ss:$12 sps:$4 sm:$0xff]   ;;  %v3157_v39 = vld [vmem:[%s4088_s5 + $0x398] ss:$12 sps:$4 sm:$0xff]  }
 0x1da   :  { %v1075_v46 = vpop.f32.mrb[10].mxu1  ;;  %1952 = vmatprep.subr.bf16.mxu1 %v3107_v40  ;;  %2751 = vmatprep.subr.bf16.mxu0 %v3108_v41  ;;  %v3160_v40 = vld [vmem:[%s4088_s5 + $0x2ec] ss:$12 sps:$4 sm:$0xff]   ;;  %v3158_v41 = vld [vmem:[%s4088_s5 + $0x2e8] ss:$12 sps:$4 sm:$0xff]  }
 0x1db   :  { %v2820_v49 = vpop.f32.mrb[11].mxu1 }
 0x1dc   :  { %v3170_v49 = vld [vmem:[%s4088_s5 + $0x334] ss:$12 sps:$4 sm:$0xff]  }
 0x1dd   :  { %1953 = vmatpush1.bf16.msra.mxu1 %v3105_v44  ;;  %2752 = vmatpush3.bf16.msra.mxu0 %v3109_v45  ;;  %v3164_v44 = vld [vmem:[%s4088_s5 + $0x304] ss:$12 sps:$4 sm:$0xff]   ;;  %v3162_v45 = vld [vmem:[%s4088_s5 + $0x300] ss:$12 sps:$4 sm:$0xff]  }
 0x1de   :  { %1954 = vmatprep.subr.bf16.mxu1 %v3112_v47  ;;  %2753 = vmatprep.subr.bf16.mxu0 %v3113_v48  ;;  %v3167_v47 = vld [vmem:[%s4088_s5 + $0x31c] ss:$12 sps:$4 sm:$0xff]   ;;  %v3165_v48 = vld [vmem:[%s4088_s5 + $0x318] ss:$12 sps:$4 sm:$0xff]  }
 0x1e1   :  { %1955 = vmatpush1.bf16.msra.mxu1 %v3110_v50  ;;  %2754 = vmatpush3.bf16.msra.mxu0 %v3114_v51  ;;  %v3168_v50 = vld [vmem:[%s4088_s5 + $0x330] ss:$12 sps:$4 sm:$0xff]   ;;  %v3173_v51 = vld [vmem:[%s4088_s5 + $0x34c] ss:$12 sps:$4 sm:$0xff]  }
 0x1e2   :  { %1956 = vmatprep.subr.bf16.mxu1 %v3117_v52  ;;  %2755 = vmatprep.subr.bf16.mxu0 %v3118_v53  ;;  %v3176_v52 = vld [vmem:[%s4088_s5 + $0x364] ss:$12 sps:$4 sm:$0xff]   ;;  %v3174_v53 = vld [vmem:[%s4088_s5 + $0x360] ss:$12 sps:$4 sm:$0xff]  }
 0x1e5   :  { %1957 = vmatpush1.bf16.msra.mxu1 %v3115_v54  ;;  %2756 = vmatpush3.bf16.msra.mxu0 %v3119_v55  ;;  %v3179_v54 = vld [vmem:[%s4088_s5 + $0x37c] ss:$12 sps:$4 sm:$0xff]   ;;  %v3177_v55 = vld [vmem:[%s4088_s5 + $0x378] ss:$12 sps:$4 sm:$0xff]  }
 0x1e6   :  { %1958 = vmatprep.subr.bf16.mxu1 %v3122_v57  ;;  %2757 = vmatprep.subr.bf16.mxu0 %v3123_v58  ;;  %v3180_v57 = vld [vmem:[%s4088_s5 + $0x390] ss:$12 sps:$4 sm:$0xff]   ;;  %v3185_v58 = vld [vmem:[%s4088_s5 + $0x3ac] ss:$12 sps:$4 sm:$0xff]  }
 0x1e7   :  { %v2712_v2 = vpop.f32.mrb[8].mxu0 }
 0x1e8   :  { %v2713_v6 = vpop.f32.mrb[9].mxu0 }
 0x1e9   :  { %v2714_v7 = vadd.f32 %v2713_v6, %v2712_v2  ;;  %1959 = vmatpush1.bf16.msra.mxu1 %v3120_v60  ;;  %2758 = vmatpush3.bf16.msra.mxu0 %v3124_v61  ;;  %v2715_v8 = vpop.f32.mrb[10].mxu0  ;;  %v3186_v60 = vld [vmem:[%s4091_s7 + $0x40] sm:$0xff]   ;;  %v3191_v2 = vld [vmem:[%s4091_s7 + $0x10] sm:$0xff]   ;;  %v3193_v6 = vld [vmem:[%s4091_s7 + $0x18] sm:$0xff]  }
 0x1ea   :  { %v2716_v12 = vpop.f32.mrb[11].mxu0  ;;  %1960 = vmatprep.subr.bf16.mxu1 %v3127_v63  ;;  %2759 = vmatprep.subr.bf16.mxu0 %v3128_v0  ;;  %v3187_v61 = vld [vmem:[%s4091_s7] sm:$0xff]   ;;  %v3189_v63 = vld [vmem:[%s4091_s7 + $0x8] sm:$0xff]   ;;  %v3190_v0 = vld [vmem:[%s4091_s7 + $0x50] sm:$0xff]  }
 0x1eb   :  { %v1033_v13 = vadd.f32 %v2714_v7, %v304_v5  ;;  %v3192_v5 = vld [vmem:[%s4091_s7 + $0x58] sm:$0xff]   ;;  %v3194_v7 = vld [vmem:[%s4091_s7 + $0x60] sm:$0xff]   ;;  %v3199_v12 = vld [vmem:[%s4091_s7 + $0x30] sm:$0xff]  }
 0x1ec   :  { %v3195_v8 = vld [vmem:[%s4091_s7 + $0x20] sm:$0xff]  }
 0x1ed   :  { %v3872_v14 = vadd.f32 %v1072_v42, %v1033_v13  ;;  %1961 = vmatpush1.bf16.msra.mxu1 %v3125_v9  ;;  %2760 = vmatpush3.bf16.msra.mxu0 %v3129_v10  ;;  %v3161_v42 = vld [vmem:[%s4088_s5 + $0x3b0] ss:$12 sps:$4 sm:$0xff]   ;;  %v3196_v9 = vld [vmem:[%s4091_s7 + $0x68] sm:$0xff]  }
 0x1ee   :  { %1962 = vmatprep.subr.bf16.mxu1 %v3132_v4  ;;  %2821 = vmatprep.subr.bf16.mxu0 %v3207_v3  ;;  %v3197_v10 = vld [vmem:[%s4091_s7 + $0x28] sm:$0xff]   ;;  %v3200_v4 = vld [vmem:[%s4091_s7 + $0x78] sm:$0xff]  }
 0x1ef   :  { %v1082_v43 = vmax.f32 %v3872_v14, 0.0  ;;  %v3201_v13 = vld [vmem:[%s4091_s7 + $0x38] sm:$0xff]  }
 0x1f0   :  { %2101 = vmatmul.mubr.bf16.vlgmr.msra.gmra.mrb[16].mxu0 %v1085_v20 }
 0x1f1   :  { %1963 = vmatpush1.bf16.msra.mxu1 %v3130_v16  ;;  %2822 = vmatpush3.bf16.msra.mxu0 %v3133_v19  ;;  %v1087_v46 = vpack.c.bf16 %v1082_v43, %v1082_v43 }
 0x1f2   :  { %1964 = vmatprep.subr.bf16.mxu1 %v3136_v21  ;;  %2823 = vmatprep.subr.bf16.mxu0 %v3207_v3 }
 0x1f3   :  { %2837 = vmatprep.mubr.msk.bf16.mxu0 %vm3208_vm1, %v3207_v3 }
 0x1f5   :  { %1965 = vmatpush1.bf16.msra.mxu1 %v3134_v22  ;;  %2824 = vmatpush3.bf16.msra.mxu0 %v3137_v23  ;;  %v1248_v22 = vld [vmem:[%s4092_s6] sm:$0x7] }
 0x1f6   :  { %1966 = vmatprep.subr.bf16.mxu1 %v3140_v24  ;;  %2825 = vmatprep.subr.bf16.mxu0 %v3207_v3  ;;  %v1261_v23 = vrot.slane %v1248_v22, %v3490_v33 }
 0x1f9   :  { %1967 = vmatpush1.bf16.msra.mxu1 %v3138_v25  ;;  %2826 = vmatpush3.bf16.msra.mxu0 %v3141_v26 }
 0x1fa   :  { %1968 = vmatprep.subr.bf16.mxu1 %v3144_v27  ;;  %2827 = vmatprep.subr.bf16.mxu0 %v3207_v3 }
 0x1fd   :  { %1969 = vmatpush1.bf16.msra.mxu1 %v3142_v28  ;;  %2828 = vmatpush3.bf16.msra.mxu0 %v3145_v29 }
 0x1fe   :  { %1970 = vmatprep.subr.bf16.mxu1 %v3148_v30  ;;  %2829 = vmatprep.subr.bf16.mxu0 %v3207_v3 }
 0x201   :  { %1971 = vmatpush1.bf16.msra.mxu1 %v3146_v31  ;;  %2830 = vmatpush3.bf16.msra.mxu0 %v3149_v32 }
 0x202   :  { %1972 = vmatprep.subr.bf16.mxu1 %v3152_v34  ;;  %2831 = vmatprep.subr.bf16.mxu0 %v3207_v3 }
 0x205   :  { %1973 = vmatpush1.bf16.msra.mxu1 %v3150_v35  ;;  %2832 = vmatpush3.bf16.msra.mxu0 %v3153_v36 }
 0x206   :  { %1974 = vmatprep.subr.bf16.mxu1 %v3156_v37  ;;  %2833 = vmatprep.subr.bf16.mxu0 %v3207_v3  ;;  %v1253_v37 = vrot.slane %v1248_v22, %v3482_v17  ;;  %v3203_v17 = vld [vmem:[%s4091_s7 + $0x88] sm:$0xff]  }
 0x209   :  { %1975 = vmatpush1.bf16.msra.mxu1 %v3154_v38  ;;  %2834 = vmatpush3.bf16.msra.mxu0 %v3157_v39  ;;  %v1257_v38 = vrot.slane %v1248_v22, %v3485_v18  ;;  %v3204_v18 = vld [vmem:[%s4091_s7 + $0x90] sm:$0xff]  }
 0x20a   :  { %1976 = vmatprep.subr.bf16.mxu1 %v3160_v40  ;;  %2835 = vmatprep.subr.bf16.mxu0 %v3207_v3 }
 0x20d   :  { %1977 = vmatpush1.bf16.msra.mxu1 %v3158_v41  ;;  %2836 = vmatpush3.bf16.msra.mxu0 %v3161_v42 }
 0x20e   :  { %1987 = vmatprep.subr.bf16.mxu1 %v3164_v44  ;;  %2776 = vmatprep.subr.bf16.mxu0 %v3186_v60 }
 0x210   :  { %1979 = vmatmul.mubr.bf16.vlgmr.msra.gmra.mrb[12].mxu1 %v1085_v20  ;;  %2838 = vmatmul.mubr.bf16.vlgmr.msra.gmra.mrb[20].mxu0 %v1087_v46 }
 0x211   :  { %1988 = vmatpush1.bf16.msra.mxu1 %v3162_v45  ;;  %2019 = vmatprep.mubr.bf16.mxu1 %v3206_v1  ;;  %v3171_v1 = vld [vmem:[%s4088_s5 + $0x348] ss:$12 sps:$4 sm:$0xff]  }
 0x212   :  { %1989 = vmatprep.subr.bf16.mxu1 %v3167_v47  ;;  %2777 = vmatpush3.bf16.msra.mxu0 %v3187_v61  ;;  %v3202_v47 = vld [vmem:[%s4091_s7 + $0x80] sm:$0xff]  }
 0x213   :  { %2778 = vmatprep.subr.bf16.mxu0 %v3188_v62 }
 0x215   :  { %1990 = vmatpush1.bf16.msra.mxu1 %v3165_v48 }
 0x216   :  { %1991 = vmatprep.subr.bf16.mxu1 %v3170_v49  ;;  %2779 = vmatpush3.bf16.msra.mxu0 %v3189_v63  ;;  %v3205_v49 = vld [vmem:[%s4091_s7 + $0x98] sm:$0xff]   ;;  %s3209_s7 = smov 127  }
 0x217   :  { %2780 = vmatprep.subr.bf16.mxu0 %v3190_v0 }
 0x219   :  { %1992 = vmatpush1.bf16.msra.mxu1 %v3168_v50 }
 0x21a   :  { %1993 = vmatprep.subr.bf16.mxu1 %v3173_v51  ;;  %2781 = vmatpush3.bf16.msra.mxu0 %v3191_v2 }
 0x21b   :  { %2782 = vmatprep.subr.bf16.mxu0 %v3192_v5 }
 0x21d   :  { %1994 = vmatpush1.bf16.msra.mxu1 %v3171_v1 }
 0x21e   :  { %1995 = vmatprep.subr.bf16.mxu1 %v3176_v52  ;;  %2783 = vmatpush3.bf16.msra.mxu0 %v3193_v6 }
 0x21f   :  { %2784 = vmatprep.subr.bf16.mxu0 %v3194_v7 }
 0x221   :  { %1996 = vmatpush1.bf16.msra.mxu1 %v3174_v53 }
 0x222   :  { %1997 = vmatprep.subr.bf16.mxu1 %v3179_v54  ;;  %2785 = vmatpush3.bf16.msra.mxu0 %v3195_v8 }
 0x223   :  { %2786 = vmatprep.subr.bf16.mxu0 %v3196_v9 }
 0x225   :  { %1998 = vmatpush1.bf16.msra.mxu1 %v3177_v55 }
 0x226   :  { %1999 = vmatprep.subr.bf16.mxu1 %v3182_v56  ;;  %2787 = vmatpush3.bf16.msra.mxu0 %v3197_v10  ;;  %v2672_v56 = vld [vmem:[%s4093_s8] ss:$0 sm:$0xff] }
 0x227   :  { %2788 = vmatprep.subr.bf16.mxu0 %v3198_v11 }
 0x229   :  { %2000 = vmatpush1.bf16.msra.mxu1 %v3180_v57 }
 0x22a   :  { %2001 = vmatprep.subr.bf16.mxu1 %v3185_v58  ;;  %2789 = vmatpush3.bf16.msra.mxu0 %v3199_v12 }
 0x22b   :  { %2790 = vmatprep.subr.bf16.mxu0 %v3200_v4 }
 0x22d   :  { %2002 = vmatpush1.bf16.msra.mxu1 %v3183_v59 }
 0x22e   :  { %2791 = vmatpush3.bf16.msra.mxu0 %v3201_v13 }
 0x22f   :  { %2841 = vmatprep.subr.bf16.mxu0 %v3207_v3 }
 0x230   :  { %2020 = vmatmul.mubr.bf16.vlgmr.msra.gmra.mrb[12].mxu1 %v1087_v46 }
 0x2a3   :  { %v2739_v14 = vpop.f32.mrb[12].mxu0 }
 0x2a4   :  { %v2740_v16 = vpop.f32.mrb[13].mxu0 }
 0x2a5   :  { %v2741_v19 = vadd.f32 %v2740_v16, %v2739_v14  ;;  %v2742_v20 = vpop.f32.mrb[14].mxu0 }
 0x2a6   :  { %v2743_v21 = vpop.f32.mrb[15].mxu0 }
 0x2a7   :  { %v2063_v26 = vadd.f32 %v2741_v19, %v1261_v23 }
 0x2c3   :  { %v2761_v24 = vpop.f32.mrb[16].mxu0 }
 0x2c4   :  { %v2762_v25 = vpop.f32.mrb[17].mxu0 }
 0x2c5   :  { %v2763_v27 = vadd.f32 %v2762_v25, %v2761_v24  ;;  %v2764_v28 = vpop.f32.mrb[18].mxu0 }
 0x2c6   :  { %v2765_v29 = vpop.f32.mrb[19].mxu0 }
 0x2c7   :  { %v2103_v30 = vadd.f32 %v2763_v27, %v2063_v26 }
 0x2e3   :  { %v2142_v31 = vpop.f32.mrb[20].mxu0 }
 0x2e4   :  { %v2143_v32 = vadd.f32 %v2142_v31, %v2103_v30  ;;  %v2839_v34 = vpop.f32.mrb[21].mxu0 }
 0x2e5   :  { %v2145_v35 = vpop.f32.mrb[22].mxu0 }
 0x2e6   :  { %v2840_v36 = vpop.f32.mrb[23].mxu0  ;;  %v2150_v50 = vmax.f32 %v2143_v32, 0.0 }
 0x2e8   :  { %v2153_v51 = vpack.c.bf16 %v2150_v50, %v2150_v50 }
 0x303   :  { %v2021_v39 = vpop.f32.mrb[12].mxu1 }
 0x304   :  { %v2857_v40 = vadd.f32 %v2021_v39, %v1253_v37  ;;  %v2023_v41 = vpop.f32.mrb[13].mxu1 }
 0x305   :  { %v2858_v33 = vadd.f32 %v2023_v41, %v1257_v38  ;;  %v2025_v42 = vpop.f32.mrb[14].mxu1 }
 0x306   :  { %v2148_v43 = vmax.f32 %v2857_v40, 0.0  ;;  %v2026_v44 = vpop.f32.mrb[15].mxu1 }
 0x307   :  { %v2149_v45 = vmax.f32 %v2858_v33, 0.0 }
 0x308   :  { %v2151_v48 = vpack.c.bf16 %v2148_v43, %v2148_v43 }
 0x309   :  { %v2152_v46 = vpack.c.bf16 %v2149_v45, %v2149_v45 }
 0x30b   :  { %2356 = vmatprep.mubr.bf16.mxu0 %v2152_v46 }
 0x30c   :  { %2357 = vmatmul.mubr.bf16.vlgmr.msra.gmra.mrb[24].mxu0 %v2151_v48 }
 0x30d   :  { %2842 = vmatpush3.bf16.msra.mxu0 %v3202_v47  ;;  %2849 = vmatprep.mubr.msk.bf16.mxu0 %vm3208_vm1, %v3207_v3 }
 0x30e   :  { %2843 = vmatprep.subr.bf16.mxu0 %v3207_v3 }
 0x311   :  { %2844 = vmatpush3.bf16.msra.mxu0 %v3203_v17 }
 0x312   :  { %2845 = vmatprep.subr.bf16.mxu0 %v3207_v3 }
 0x315   :  { %2846 = vmatpush3.bf16.msra.mxu0 %v3204_v18 }
 0x316   :  { %2847 = vmatprep.subr.bf16.mxu0 %v3207_v3 }
 0x319   :  { %2848 = vmatpush3.bf16.msra.mxu0 %v3205_v49 }
 0x31c   :  { %2850 = vmatmul.mubr.msk.bf16.vlgmr.msra.gmra.mrb[28].mxu0 %vm830_vm3, %v2153_v51 }
 0x3df   :  { %v2792_v1 = vpop.f32.mrb[24].mxu0 }
 0x3e0   :  { %v2793_v52 = vpop.f32.mrb[25].mxu0 }
 0x3e1   :  { %v2794_v53 = vadd.f32 %v2793_v52, %v2792_v1  ;;  %v2795_v54 = vpop.f32.mrb[26].mxu0 }
 0x3e2   :  { %v2796_v55 = vpop.f32.mrb[27].mxu0 }
 0x3e3   :  { %v2359_v57 = vadd.f32 %v2794_v53, %v2672_v56 }
 0x3ef   :  { %v2398_v58 = vpop.f32.mrb[28].mxu0 }
 0x3f0   :  { %v2399_v59 = vadd.f32 %v2398_v58, %v2359_v57  ;;  %v2851_v60 = vpop.f32.mrb[29].mxu0 }
 0x3f1   :  { %v2401_v3 = vpop.f32.mrb[30].mxu0 }
 0x3f2   :  { %v2852_v61 = vpop.f32.mrb[31].mxu0  ;;  %2430 = vperm.xlu1 %2881, %v2399_v59   ;;  %v2407_v62 = vsel %vm2406_vm4, %v2399_v59, 0.0 }
 0x3f3   :  { %2409 = vrot.lane.b32.xlu0 %v2407_v62, %s3209_s7 }
 0x465   :  { %v2410_v63 = vpop.permute.xlu0 %2409 }
 0x466   :  { %v2413_v0 = vsel %vm2412_vm5, %v2410_v63, 0.0 }
 0x467   :  { %2414 = vadd.xlane.f32.xlu0 %v2413_v0 }
 0x471   :  { %v2431_v12 = vpop.permute.xlu1 %2430 }
 0x4f4   :  { %v2415_v2 = vpop.xlane.xlu0 %2414 }
 0x4f5   :  { %v2416_v5 = vrot.slane %v2415_v2, 4 }
 0x4f7   :  { %v2417_v6 = vadd.f32 %v2416_v5, %v2415_v2 }
 0x4f9   :  { %v2418_v7 = vrot.slane %v2417_v6, 2 }
 0x4fb   :  { %v2419_v8 = vadd.f32 %v2418_v7, %v2417_v6 }
 0x4fd   :  { %v2420_v9 = vrot.slane %v2419_v8, 1 }
 0x4ff   :  { %v2421_v15 = vadd.f32 %v2420_v9, %v2419_v8 }
 0x501   :  { %2875 = vpush %v2421_v15 }
 0x532   :  { %s2876_s8 = spop %2875 }
 0x533   :  { %s2425_s29 = smul.f32 0.125, %s2876_s8 }
 0x535   :  { %v2426_v10 = vstv %s2425_s29 }
 0x536   :  { %v2427_v11 = vsub.f32 %v2399_v59, %v2426_v10 }
 0x538   :  { %v2433_v4 = vadd.f32 %v2431_v12, %v2427_v11 }
 0x53a   :  { %2435 = vrot.lane.b32.xlu1 %v2433_v4, %s3209_s7 }
 0x5ac   :  { %v2436_v13 = vpop.permute.xlu1 %2435 }
 0x5ad   :  { %2438 = vst.msk [vmem:[%s4094_s9] sm:$0xff] %vm2412_vm5, %v2436_v13 }

</bundles_post_ra>
